<compile_context>
chip_gen: v5e
topology: v5e:2x2
jax: 0.10.0
libtpu: 0.0.40
codegen_flags: <defaults>
</compile_context>

<pallas_src>
import jax
import jax.numpy as jnp
from jax.experimental import pallas as pl
from jax.experimental.pallas import tpu as pltpu


def _round_up(n, m):
    return ((n + m - 1) // m) * m


def _cdiv(a, b):
    return -(-a // b)


def _vmem_estimate_bytes(tb, in_dim, wbytes=2):
    """Rough VMEM footprint: double-buffered x tile + resident weights + f32 activations."""
    x_tile = 2 * tb * in_dim * 4
    out_tile = 2 * tb * 4
    weights = 2 * (in_dim * 512 + 512 * 256 + 256 * 128) * wbytes
    biases = 2 * (512 + 256 + 128 + 128) * 4
    acts = 2 * tb * (512 + 256 + 128) * 4          # f32 activations + bf16 copies margin
    return x_tile + out_tile + weights + biases + acts


def critic_kernel(x_ref,
                  w1_ref, b1_ref,
                  w2_ref, b2_ref,
                  w3_ref, b3_ref,
                  w4_ref, b4_ref,
                  o_ref):
    slope = jnp.float32(0.2)
    cdt = w1_ref.dtype  # matmul operand dtype (bf16 by default; f32 path if weights are f32)

    def leaky_relu(h):
        return jnp.where(h > 0, h, slope * h)

    # Layer 1: x is read as f32 and cast on the VPU (hidden under the MXU).
    x = x_ref[...].astype(cdt)
    h = jnp.dot(x, w1_ref[...], preferred_element_type=jnp.float32) + b1_ref[...]
    h = leaky_relu(h)

    # Layer 2.
    h = jnp.dot(h.astype(cdt), w2_ref[...],
                preferred_element_type=jnp.float32) + b2_ref[...]
    h = leaky_relu(h)

    # Layer 3.
    h = jnp.dot(h.astype(cdt), w3_ref[...],
                preferred_element_type=jnp.float32) + b3_ref[...]
    h = leaky_relu(h)

    # Layer 4 (128 -> 1), produced lane-dense: score[0, t] = sum_k w4[0, k] * h[t, k].
    # Same contraction pattern as attention q @ k^T, so it lowers natively; the result
    # lands with the batch dimension on lanes -> dense (1, TB) store, no masked vst.
    score = jnp.einsum("ok,tk->ot", w4_ref[...], h,
                       preferred_element_type=jnp.float32)
    o_ref[...] = (score + b4_ref[0, 0]).astype(o_ref.dtype)


def prepare_params(params, compute_dtype=jnp.bfloat16):
    """One-time conversion of f32 params to kernel-ready form (hoisted off the hot path).
    Set compute_dtype=jnp.float32 for a full-precision path (e.g. gradient-penalty studies)."""
    return {
        "w1": params["w1"].astype(compute_dtype),
        "b1": params["b1"],
        "w2": params["w2"].astype(compute_dtype),
        "b2": params["b2"],
        "w3": params["w3"].astype(compute_dtype),
        "b3": params["b3"],
        "w4": params["w4"].reshape(1, -1),   # (1, 128) f32, final layer stays f32
        "b4": params["b4"].reshape(1, 1),    # (1, 1) f32 -> SMEM scalar
    }


def critic_forward(x, prep, *, tb_max=2048, vmem_budget=40 * 1024 * 1024):
    """x: (B, C, L) float32.  prep: output of prepare_params()."""
    B = x.shape[0]
    x_flat = x.reshape(B, -1)            # same semantics as torch x.view(B, -1)
    in_dim = x_flat.shape[1]

    # Batch tile selection:
    #   B <= 256 : single full-extent block (no OOB rows, no divisibility constraints).
    #   B  > 256 : multiple-of-256 tile, at least 2 tiles (both v7x TensorCores busy),
    #              shrunk if the estimated VMEM footprint exceeds the budget.
    if B <= 256:
        TB = B
    else:
        TB = min(tb_max, _round_up(_cdiv(B, 2), 256))
        wbytes = jnp.dtype(prep["w1"].dtype).itemsize
        while TB > 256 and _vmem_estimate_bytes(TB, in_dim, wbytes) > vmem_budget:
            TB -= 256
    num_tiles = _cdiv(B, TB)

    def const_spec(shape):
        return pl.BlockSpec(shape, lambda i: (0, 0))

    out = pl.pallas_call(
        critic_kernel,
        out_shape=jax.ShapeDtypeStruct((1, num_tiles * TB), jnp.float32),
        grid=(num_tiles,),
        in_specs=[
            pl.BlockSpec((TB, in_dim), lambda i: (i, 0)),        # x: tiled over batch
            const_spec(prep["w1"].shape), const_spec(prep["b1"].shape),
            const_spec(prep["w2"].shape), const_spec(prep["b2"].shape),
            const_spec(prep["w3"].shape), const_spec(prep["b3"].shape),
            const_spec(prep["w4"].shape),
            pl.BlockSpec(memory_space=pltpu.MemorySpace.SMEM),   # b4 scalar
        ],
        out_specs=pl.BlockSpec((1, TB), lambda i: (0, i)),       # lane-dense score row
        compiler_params=pltpu.CompilerParams(
            dimension_semantics=("parallel",),   # shard batch tiles across TCs (v7x)
            vmem_limit_bytes=48 * 1024 * 1024,   # below v7x's 64 MiB physical VMEM
        ),
    )(x_flat, prep["w1"], prep["b1"], prep["w2"], prep["b2"],
      prep["w3"], prep["b3"], prep["w4"], prep["b4"])

    return out[0, :B].reshape(B, 1)


def init_params(key, in_dim):
    """Deterministic PyTorch-Linear-style init (uniform +-1/sqrt(fan_in)).
    Weights stored transposed: (in, out)."""
    dims = [(in_dim, 512), (512, 256), (256, 128), (128, 1)]
    params = {}
    for idx, (fan_in, fan_out) in enumerate(dims, start=1):
        key, kw, kb = jax.random.split(key, 3)
        bound = 1.0 / jnp.sqrt(jnp.float32(fan_in))
        params[f"w{idx}"] = jax.random.uniform(
            kw, (fan_in, fan_out), jnp.float32, -bound, bound)
        params[f"b{idx}"] = jax.random.uniform(
            kb, (1, fan_out), jnp.float32, -bound, bound)
    return params


def reference_forward(x, params, compute_dtype=jnp.bfloat16):
    """Pure-JAX reference mirroring the kernel's bf16-operand / f32-accumulate math."""
    h = x.reshape(x.shape[0], -1)
    h = jnp.dot(h.astype(compute_dtype), params["w1"].astype(compute_dtype),
                preferred_element_type=jnp.float32) + params["b1"]
    h = jnp.where(h > 0, h, 0.2 * h)
    h = jnp.dot(h.astype(compute_dtype), params["w2"].astype(compute_dtype),
                preferred_element_type=jnp.float32) + params["b2"]
    h = jnp.where(h > 0, h, 0.2 * h)
    h = jnp.dot(h.astype(compute_dtype), params["w3"].astype(compute_dtype),
                preferred_element_type=jnp.float32) + params["b3"]
    h = jnp.where(h > 0, h, 0.2 * h)
    return jnp.dot(h, params["w4"], preferred_element_type=jnp.float32) + params["b4"]


if __name__ == "__main__":
    # Small shapes consistent with the module: Critic(signal_length=8, channels=4)
    batch, channels, signal_length = 2, 4, 8
    in_dim = channels * signal_length

    key = jax.random.PRNGKey(0)
    key, kx = jax.random.split(key)
    x = jax.random.normal(kx, (batch, channels, signal_length), jnp.float32)

    params = init_params(key, in_dim)
    prep = prepare_params(params)            # one-time bf16 cast / reshape of weights

    out = critic_forward(x, prep)
    out = jax.block_until_ready(out)

    ref = reference_forward(x, params)
    assert out.shape == (batch, 1), out.shape
    assert jnp.allclose(out, ref, atol=1e-2, rtol=1e-2), (out, ref)

    print("KERNEL_OK")
</pallas_src>

<mosaic_0001>
module attributes {stable_mosaic.version = 11 : i64} {
  func.func @critic_kernel(%arg0: i32, %arg1: memref<2x32xf32, #tpu.memory_space<vmem>>, %arg2: memref<32x512xbf16, #tpu.memory_space<vmem>>, %arg3: memref<1x512xf32, #tpu.memory_space<vmem>>, %arg4: memref<512x256xbf16, #tpu.memory_space<vmem>>, %arg5: memref<1x256xf32, #tpu.memory_space<vmem>>, %arg6: memref<256x128xbf16, #tpu.memory_space<vmem>>, %arg7: memref<1x128xf32, #tpu.memory_space<vmem>>, %arg8: memref<1x128xf32, #tpu.memory_space<vmem>>, %arg9: memref<1x1xf32, #tpu.memory_space<smem>>, %arg10: memref<1x2xf32, #tpu.memory_space<vmem>>) attributes {dimension_semantics = [#tpu.dimension_semantics<parallel>], iteration_bounds = array<i64: 1>, scalar_prefetch = 0 : i64, scratch_operands = 0 : i64, tpu.core_type = #tpu.core_type<tc>, window_params = [{transform_indices = @transform_0, window_bounds = array<i64: 2, 32>}, {pipeline_mode = #tpu.pipeline_mode<synchronous>, transform_indices = @transform_1, window_bounds = array<i64: 32, 512>}, {pipeline_mode = #tpu.pipeline_mode<synchronous>, transform_indices = @transform_2, window_bounds = array<i64: 1, 512>}, {pipeline_mode = #tpu.pipeline_mode<synchronous>, transform_indices = @transform_3, window_bounds = array<i64: 512, 256>}, {pipeline_mode = #tpu.pipeline_mode<synchronous>, transform_indices = @transform_4, window_bounds = array<i64: 1, 256>}, {pipeline_mode = #tpu.pipeline_mode<synchronous>, transform_indices = @transform_5, window_bounds = array<i64: 256, 128>}, {pipeline_mode = #tpu.pipeline_mode<synchronous>, transform_indices = @transform_6, window_bounds = array<i64: 1, 128>}, {pipeline_mode = #tpu.pipeline_mode<synchronous>, transform_indices = @transform_7, window_bounds = array<i64: 1, 128>}, {transform_indices = @transform_8, window_bounds = array<i64: 1, 1>}, {transform_indices = @transform_9, window_bounds = array<i64: 1, 2>}]} {
    %c0 = arith.constant 0 : index
    %c0_0 = arith.constant 0 : index
    %0 = vector.load %arg1[%c0, %c0_0] : memref<2x32xf32, #tpu.memory_space<vmem>>, vector<2x32xf32>
    %1 = arith.truncf %0 : vector<2x32xf32> to vector<2x32xbf16>
    %c0_1 = arith.constant 0 : index
    %c0_2 = arith.constant 0 : index
    %2 = vector.load %arg2[%c0_1, %c0_2] : memref<32x512xbf16, #tpu.memory_space<vmem>>, vector<32x512xbf16>
    %cst = arith.constant dense<0.000000e+00> : vector<2x512xf32>
    %3 = tpu.matmul %1, %2, %cst {dimension_numbers = #tpu.dot_dimension_numbers<[1], [0], [0], [1], [0, 0, 1, 1], [], []>} : vector<2x32xbf16>, vector<32x512xbf16>, vector<2x512xf32> -> vector<2x512xf32>
    %c0_3 = arith.constant 0 : index
    %c0_4 = arith.constant 0 : index
    %4 = vector.load %arg3[%c0_3, %c0_4] : memref<1x512xf32, #tpu.memory_space<vmem>>, vector<1x512xf32>
    %5 = vector.broadcast %4 : vector<1x512xf32> to vector<2x512xf32>
    %6 = arith.addf %3, %5 : vector<2x512xf32>
    %cst_5 = arith.constant 0.000000e+00 : f32
    %7 = vector.broadcast %cst_5 : f32 to vector<2x512xf32>
    %8 = arith.cmpf ogt, %6, %7 : vector<2x512xf32>
    %cst_6 = arith.constant 2.000000e-01 : f32
    %9 = vector.broadcast %cst_6 : f32 to vector<2x512xf32>
    %10 = arith.mulf %9, %6 : vector<2x512xf32>
    %11 = arith.select %8, %6, %10 : vector<2x512xi1>, vector<2x512xf32>
    %12 = arith.truncf %11 : vector<2x512xf32> to vector<2x512xbf16>
    %c0_7 = arith.constant 0 : index
    %c0_8 = arith.constant 0 : index
    %13 = vector.load %arg4[%c0_7, %c0_8] : memref<512x256xbf16, #tpu.memory_space<vmem>>, vector<512x256xbf16>
    %cst_9 = arith.constant dense<0.000000e+00> : vector<2x256xf32>
    %14 = tpu.matmul %12, %13, %cst_9 {dimension_numbers = #tpu.dot_dimension_numbers<[1], [0], [0], [1], [0, 0, 1, 1], [], []>} : vector<2x512xbf16>, vector<512x256xbf16>, vector<2x256xf32> -> vector<2x256xf32>
    %c0_10 = arith.constant 0 : index
    %c0_11 = arith.constant 0 : index
    %15 = vector.load %arg5[%c0_10, %c0_11] : memref<1x256xf32, #tpu.memory_space<vmem>>, vector<1x256xf32>
    %16 = vector.broadcast %15 : vector<1x256xf32> to vector<2x256xf32>
    %17 = arith.addf %14, %16 : vector<2x256xf32>
    %cst_12 = arith.constant 0.000000e+00 : f32
    %18 = vector.broadcast %cst_12 : f32 to vector<2x256xf32>
    %19 = arith.cmpf ogt, %17, %18 : vector<2x256xf32>
    %cst_13 = arith.constant 2.000000e-01 : f32
    %20 = vector.broadcast %cst_13 : f32 to vector<2x256xf32>
    %21 = arith.mulf %20, %17 : vector<2x256xf32>
    %22 = arith.select %19, %17, %21 : vector<2x256xi1>, vector<2x256xf32>
    %23 = arith.truncf %22 : vector<2x256xf32> to vector<2x256xbf16>
    %c0_14 = arith.constant 0 : index
    %c0_15 = arith.constant 0 : index
    %24 = vector.load %arg6[%c0_14, %c0_15] : memref<256x128xbf16, #tpu.memory_space<vmem>>, vector<256x128xbf16>
    %cst_16 = arith.constant dense<0.000000e+00> : vector<2x128xf32>
    %25 = tpu.matmul %23, %24, %cst_16 {dimension_numbers = #tpu.dot_dimension_numbers<[1], [0], [0], [1], [0, 0, 1, 1], [], []>} : vector<2x256xbf16>, vector<256x128xbf16>, vector<2x128xf32> -> vector<2x128xf32>
    %c0_17 = arith.constant 0 : index
    %c0_18 = arith.constant 0 : index
    %26 = vector.load %arg7[%c0_17, %c0_18] : memref<1x128xf32, #tpu.memory_space<vmem>>, vector<1x128xf32>
    %27 = vector.broadcast %26 : vector<1x128xf32> to vector<2x128xf32>
    %28 = arith.addf %25, %27 : vector<2x128xf32>
    %cst_19 = arith.constant 0.000000e+00 : f32
    %29 = vector.broadcast %cst_19 : f32 to vector<2x128xf32>
    %30 = arith.cmpf ogt, %28, %29 : vector<2x128xf32>
    %cst_20 = arith.constant 2.000000e-01 : f32
    %31 = vector.broadcast %cst_20 : f32 to vector<2x128xf32>
    %32 = arith.mulf %31, %28 : vector<2x128xf32>
    %33 = arith.select %30, %28, %32 : vector<2x128xi1>, vector<2x128xf32>
    %c0_21 = arith.constant 0 : index
    %c0_22 = arith.constant 0 : index
    %34 = vector.load %arg8[%c0_21, %c0_22] : memref<1x128xf32, #tpu.memory_space<vmem>>, vector<1x128xf32>
    "tpu.trace_start"() <{level = 10 : i32, message = "ok,tk->ot"}> : () -> ()
    %cst_23 = arith.constant dense<0.000000e+00> : vector<1x2xf32>
    %35 = tpu.matmul %34, %33, %cst_23 {dimension_numbers = #tpu.dot_dimension_numbers<[1], [1], [0], [0], [0, 0, 1, 0], [], []>} : vector<1x128xf32>, vector<2x128xf32>, vector<1x2xf32> -> vector<1x2xf32>
    "tpu.trace_stop"() : () -> ()
    %c0_24 = arith.constant 0 : index
    %c0_25 = arith.constant 0 : index
    %36 = memref.load %arg9[%c0_24, %c0_25] : memref<1x1xf32, #tpu.memory_space<smem>>
    %37 = vector.broadcast %36 : f32 to vector<1x2xf32>
    %38 = arith.addf %35, %37 : vector<1x2xf32>
    %c0_26 = arith.constant 0 : index
    %c0_27 = arith.constant 0 : index
    %39 = vector.load %arg10[%c0_26, %c0_27] : memref<1x2xf32, #tpu.memory_space<vmem>>, vector<1x2xf32>
    tpu.vector_store %arg10[%c0_26, %c0_27], %38 {strides = array<i32>} : memref<1x2xf32, #tpu.memory_space<vmem>>, vector<1x2xf32>,
    return
  }
  func.func @transform_0(%arg0: i32) -> (i32, i32) {
    %c0_i32 = arith.constant 0 : i32
    %c0_i32_0 = arith.constant 0 : i32
    return %arg0, %c0_i32 : i32, i32
  }
  func.func @transform_1(%arg0: i32) -> (i32, i32) {
    %c0_i32 = arith.constant 0 : i32
    %c0_i32_0 = arith.constant 0 : i32
    %c0_i32_1 = arith.constant 0 : i32
    return %c0_i32, %c0_i32_0 : i32, i32
  }
  func.func @transform_2(%arg0: i32) -> (i32, i32) {
    %c0_i32 = arith.constant 0 : i32
    %c0_i32_0 = arith.constant 0 : i32
    %c0_i32_1 = arith.constant 0 : i32
    return %c0_i32, %c0_i32_0 : i32, i32
  }
  func.func @transform_3(%arg0: i32) -> (i32, i32) {
    %c0_i32 = arith.constant 0 : i32
    %c0_i32_0 = arith.constant 0 : i32
    %c0_i32_1 = arith.constant 0 : i32
    return %c0_i32, %c0_i32_0 : i32, i32
  }
  func.func @transform_4(%arg0: i32) -> (i32, i32) {
    %c0_i32 = arith.constant 0 : i32
    %c0_i32_0 = arith.constant 0 : i32
    %c0_i32_1 = arith.constant 0 : i32
    return %c0_i32, %c0_i32_0 : i32, i32
  }
  func.func @transform_5(%arg0: i32) -> (i32, i32) {
    %c0_i32 = arith.constant 0 : i32
    %c0_i32_0 = arith.constant 0 : i32
    %c0_i32_1 = arith.constant 0 : i32
    return %c0_i32, %c0_i32_0 : i32, i32
  }
  func.func @transform_6(%arg0: i32) -> (i32, i32) {
    %c0_i32 = arith.constant 0 : i32
    %c0_i32_0 = arith.constant 0 : i32
    %c0_i32_1 = arith.constant 0 : i32
    return %c0_i32, %c0_i32_0 : i32, i32
  }
  func.func @transform_7(%arg0: i32) -> (i32, i32) {
    %c0_i32 = arith.constant 0 : i32
    %c0_i32_0 = arith.constant 0 : i32
    %c0_i32_1 = arith.constant 0 : i32
    return %c0_i32, %c0_i32_0 : i32, i32
  }
  func.func @transform_8(%arg0: i32) -> (i32, i32) {
    %c0_i32 = arith.constant 0 : i32
    %c0_i32_0 = arith.constant 0 : i32
    %c0_i32_1 = arith.constant 0 : i32
    return %c0_i32, %c0_i32_0 : i32, i32
  }
  func.func @transform_9(%arg0: i32) -> (i32, i32) {
    %c0_i32 = arith.constant 0 : i32
    %c0_i32_0 = arith.constant 0 : i32
    return %c0_i32, %arg0 : i32, i32
  }
}

</mosaic_0001>

<bundles_post_ra>
// kernel: tpu_custom_call.1
= control target key start
LH: loop header
LB: loop body
LE: loop exit
PB: predicated region body
PF: predicated region fallthrough
CT: control target
= control target key end

     0   :  { %15 = vsyncpa [#allocation4], 0  ;;  %s1620_s0 = inlined_call_operand.vmem [shape: f32[2,32], index: 0, kind: input, shape index: {}]   ;;  %s1621_s1 = inlined_call_operand.hbm [shape: bf16[32,512], index: 1, kind: input, shape index: {}]   ;;  %s1622_s2 = inlined_call_operand.hbm [shape: f32[1,512], index: 2, kind: input, shape index: {}]   ;;  %s1623_s3 = inlined_call_operand.hbm [shape: bf16[512,256], index: 3, kind: input, shape index: {}]   ;;  %s1624_s4 = inlined_call_operand.vmem [shape: f32[1,256], index: 4, kind: input, shape index: {}]   ;;  %s1625_s5 = inlined_call_operand.hbm [shape: bf16[256,128], index: 5, kind: input, shape index: {}]   ;;  %s1626_s6 = inlined_call_operand.vmem [shape: f32[1,128], index: 6, kind: input, shape index: {}]   ;;  %s1627_s7 = inlined_call_operand.vmem [shape: f32[1,128], index: 7, kind: input, shape index: {}]   ;;  %s1628_s8 = inlined_call_operand.<no memory space> [shape: f32[1,1], index: 8, kind: input, shape index: {}]   ;;  %s1629_s9 = inlined_call_operand.hbm [shape: f32[1,2], index: 9, kind: output, shape index: {}]  }
   0x1   :  { %16 = vsyncpa [#allocation7], 0 }
   0x2   :  { %17 = vsyncpa [#allocation10], 0  ;;  %s39_s11 = sshll.u32 %s1622_s2, 4  ;;  %s40_s11 = int_to_ptr.hbm [resolvable:$true] %s39_s11 }
   0x3   :  { %18 = vsyncpa [#allocation5], 0  ;;  %s1519_s12 = smov [#allocation6]   ;;  %s25_s16 = sshll.u32 %s1621_s1, 4  ;;  %s26_s16 = int_to_ptr.hbm [resolvable:$true] %s25_s16 }
   0x4   :  { %s41_s13 = sshll.u32 %s1519_s12, 4  ;;  %s1520_s17 = smov [#allocation3]   ;;  %s42_s13 = int_to_ptr.vmem [resolvable:$true] %s41_s13 }
   0x5   :  { %44 = dma.hbm_to_vmem [thread:$0]  %s40_s11, 64, %s42_s13, [#allocation7]  }
   0x6   :  { %s27_s18 = sshll.u32 %s1520_s17, 4  ;;  %s1521_s19 = smov 256   ;;  %s28_s18 = int_to_ptr.vmem [resolvable:$true] %s27_s18 }
   0x7   :  { %s1522_s20 = smov 16   ;;  %s49_s2 = sshll.u32 %s1623_s3, 4  ;;  %s50_s2 = int_to_ptr.hbm [resolvable:$true] %s49_s2 }
   0x8   :  { %33 = dma.hbm_to_vmem [thread:$0]  %s26_s16, 1024, %s28_s18, [#allocation4], %s1521_s19, %s1521_s19, %s1522_s20  }
   0x9   :  { %s1523_s23 = smov [#allocation8]   ;;  %s64_s1 = sshll.u32 %s1625_s5, 4  ;;  %s65_s1 = int_to_ptr.hbm [resolvable:$true] %s64_s1 }
   0xa   :  { %s51_s24 = sshll.u32 %s1523_s23, 4  ;;  %s1524_s27 = smov 128   ;;  %s52_s24 = int_to_ptr.vmem [resolvable:$true] %s51_s24 }
   0xb   :  { %s1525_s28 = smov 8   ;;  %s1526_s29 = smov [#allocation9]  }
   0xc   :  { %57 = dma.hbm_to_vmem [thread:$0]  %s50_s2, 8192, %s52_s24, [#allocation7], %s1524_s27, %s1524_s27, %s1525_s28  }
   0xd   :  { %s66_s30 = sshll.u32 %s1526_s29, 4  ;;  %s1527_s10 = smov 64   ;;  %s67_s30 = int_to_ptr.vmem [resolvable:$true] %s66_s30 }
   0xe   :  { %s1528_s11 = smov 4  }
   0xf   :  { %72 = dma.hbm_to_vmem [thread:$0]  %s65_s1, 2048, %s67_s30, [#allocation10], %s1527_s10, %s1527_s10, %s1528_s11  }
  0x10   :  { %1511 = dma.done.wait [#allocation4], 1024  }
  0x11   :  { %1512 = vsyncadd [#allocation4], 4294966272 }
  0x12   :  { %1513 = dma.done.wait [#allocation7], 8256  }
  0x13   :  { %1514 = vsyncadd [#allocation7], 4294959040 }
  0x14   :  { %1515 = dma.done.wait [#allocation10], 2048  }
  0x15   :  { %1516 = vsyncadd [#allocation10], 4294965248  ;;  %vm156_vm0 = vcmask 261120   ;;  %v953_v0 = vld [vmem:[#allocation3 + $0x20] sm:$0xf]  ;;  %s1529_s18 = smov [#allocation11]  }
  0x16   :  { %v1297_v1 = vld [vmem:[#allocation3 + $0x2c] sm:$0xf0]  ;;  %v1295_v2 = vld [vmem:[#allocation3 + $0x24] sm:$0xf]  ;;  %v955_v4 = vld [vmem:[#allocation3 + $0x30] sm:$0xf0] }
  0x17   :  { %v954_v3 = vor.u32 %v1297_v1, %v953_v0  ;;  %v937_v5 = vld [vmem:[#allocation3] sm:$0xf]  ;;  %v1293_v6 = vld [vmem:[#allocation3 + $0xc] sm:$0xf0]  ;;  %v958_v7 = vor.u32 %v1295_v2, %v955_v4  ;;  %v1291_v8 = vld [vmem:[#allocation3 + $0x4] sm:$0xf] }
  0x18   :  { %v939_v9 = vld [vmem:[#allocation3 + $0x10] sm:$0xf0]  ;;  %v96_v10 = vld [vmem:[%s1620_s0] sm:$0x3]  ;;  %v938_v11 = vor.u32 %v1293_v6, %v937_v5  ;;  %v961_v12 = vld [vmem:[#allocation3 + $0x28] sm:$0xf] }
  0x19   :  { %166 = vmatpush.bf16.msra.mxu3 %v954_v3  ;;  %v1298_v13 = vld [vmem:[#allocation3 + $0x34] sm:$0xf0]  ;;  %v1296_v14 = vld [vmem:[#allocation3 + $0x2c] sm:$0xf]  ;;  %179 = vmatpush.bf16.msra.mxu2 %v958_v7  ;;  %v942_v15 = vor.u32 %v1291_v8, %v939_v9  ;;  %v963_v16 = vld [vmem:[#allocation3 + $0x38] sm:$0xf0]  ;;  %v1595_v24 = vpack.c.bf16 %v96_v10, %v96_v10 }
  0x1a   :  { %v945_v17 = vld [vmem:[#allocation3 + $0x8] sm:$0xf]  ;;  %v1294_v18 = vld [vmem:[#allocation3 + $0x14] sm:$0xf0]  ;;  %v962_v19 = vor.u32 %v1298_v13, %v961_v12  ;;  %v966_v20 = vor.u32 %v1296_v14, %v963_v16  ;;  %v1292_v21 = vld [vmem:[#allocation3 + $0xc] sm:$0xf] }
  0x1b   :  { %v947_v22 = vld [vmem:[#allocation3 + $0x18] sm:$0xf0]  ;;  %v1029_v23 = vld [vmem:[#allocation8 + $0x70] sm:$0xf]  ;;  %v1021_v30 = vld [vmem:[#allocation8 + $0x60] sm:$0xf]  ;;  %v946_v35 = vor.u32 %v1294_v18, %v945_v17 }
  0x1c   :  { %v1314_v25 = vld [vmem:[#allocation8 + $0x74] sm:$0xf0]  ;;  %v1093_v26 = vld [vmem:[#allocation8 + $0xf0] sm:$0xf]  ;;  %v1312_v31 = vld [vmem:[#allocation8 + $0x64] sm:$0xf0]  ;;  %v950_v33 = vor.u32 %v1292_v21, %v947_v22 }
  0x1d   :  { %v1330_v27 = vld [vmem:[#allocation8 + $0xf4] sm:$0xf0]  ;;  %167 = vmatpush.bf16.msra.mxu3 %v938_v11  ;;  %v1030_v28 = vor.u32 %v1314_v25, %v1029_v23  ;;  %v1085_v32 = vld [vmem:[#allocation8 + $0xe0] sm:$0xf]  ;;  %180 = vmatpush.bf16.msra.mxu2 %v942_v15  ;;  %v1328_v34 = vld [vmem:[#allocation8 + $0xe4] sm:$0xf0]  ;;  %v1022_v36 = vor.u32 %v1312_v31, %v1021_v30 }
  0x1e   :  { %v1094_v29 = vor.u32 %v1330_v27, %v1093_v26  ;;  %v1086_v37 = vor.u32 %v1328_v34, %v1085_v32  ;;  %v1013_v38 = vld [vmem:[#allocation8 + $0x50] sm:$0xf]  ;;  %v1310_v39 = vld [vmem:[#allocation8 + $0x54] sm:$0xf0]  ;;  %v1005_v45 = vld [vmem:[#allocation8 + $0x40] sm:$0xf] }
  0x1f   :  { %618 = vmatpush.bf16.msra.mxu0 %v1030_v28  ;;  %v1077_v40 = vld [vmem:[#allocation8 + $0xd0] sm:$0xf]  ;;  %v1326_v41 = vld [vmem:[#allocation8 + $0xd4] sm:$0xf0]  ;;  %v1014_v44 = vor.u32 %v1310_v39, %v1013_v38  ;;  %v1308_v50 = vld [vmem:[#allocation8 + $0x44] sm:$0xf0] }
  0x20   :  { %967 = vmatmul.msk.bf16.vlgmr.msra.gmra.mxu3 %vm156_vm0, %v1595_v24  ;;  %631 = vmatpush.bf16.msra.mxu1 %v1094_v29  ;;  %v1157_v42 = vld [vmem:[#allocation8 + $0x170] sm:$0xf]  ;;  %v1346_v43 = vld [vmem:[#allocation8 + $0x174] sm:$0xf0]  ;;  %v1078_v49 = vor.u32 %v1326_v41, %v1077_v40  ;;  %v1069_v51 = vld [vmem:[#allocation8 + $0xc0] sm:$0xf]  ;;  %v1006_v59 = vor.u32 %v1308_v50, %v1005_v45 }
  0x21   :  { %205 = vmatpush.bf16.msrb.mxu3 %v966_v20  ;;  %192 = vmatpush.bf16.msrb.mxu2 %v962_v19  ;;  %v1158_v46 = vor.u32 %v1346_v43, %v1157_v42  ;;  %v1221_v47 = vld [vmem:[#allocation8 + $0x1f0] sm:$0xf]  ;;  %v1362_v48 = vld [vmem:[#allocation8 + $0x1f4] sm:$0xf0]  ;;  %v1324_v52 = vld [vmem:[#allocation8 + $0xc4] sm:$0xf0] }
  0x22   :  { %968 = vmatmul.msk.bf16.vlgmr.msra.gmra.mxu2 %vm156_vm0, %v1595_v24  ;;  %v1222_v53 = vor.u32 %v1362_v48, %v1221_v47  ;;  %v1149_v54 = vld [vmem:[#allocation8 + $0x160] sm:$0xf]  ;;  %v1344_v55 = vld [vmem:[#allocation8 + $0x164] sm:$0xf0]  ;;  %v997_v60 = vld [vmem:[#allocation8 + $0x30] sm:$0xf]  ;;  %v1070_v0 = vor.u32 %v1324_v52, %v1069_v51 }
  0x23   :  { %619 = vmatpush.bf16.msra.mxu0 %v1022_v36  ;;  %v1213_v56 = vld [vmem:[#allocation8 + $0x1e0] sm:$0xf]  ;;  %v1150_v57 = vor.u32 %v1344_v55, %v1149_v54  ;;  %v1360_v58 = vld [vmem:[#allocation8 + $0x1e4] sm:$0xf0]  ;;  %v1306_v61 = vld [vmem:[#allocation8 + $0x34] sm:$0xf0] }
  0x24   :  { %632 = vmatpush.bf16.msra.mxu1 %v1086_v37  ;;  %v1214_v62 = vor.u32 %v1360_v58, %v1213_v56  ;;  %v1141_v63 = vld [vmem:[#allocation8 + $0x150] sm:$0xf]  ;;  %v1342_v1 = vld [vmem:[#allocation8 + $0x154] sm:$0xf0]  ;;  %v1133_v8 = vld [vmem:[#allocation8 + $0x140] sm:$0xf]  ;;  %v998_v9 = vor.u32 %v1306_v61, %v997_v60 }
  0x25   :  { %206 = vmatpush.bf16.msrb.mxu3 %v950_v33  ;;  %193 = vmatpush.bf16.msrb.mxu2 %v946_v35  ;;  %v1205_v2 = vld [vmem:[#allocation8 + $0x1d0] sm:$0xf]  ;;  %v1358_v3 = vld [vmem:[#allocation8 + $0x1d4] sm:$0xf0]  ;;  %v1142_v6 = vor.u32 %v1342_v1, %v1141_v63  ;;  %v1340_v10 = vld [vmem:[#allocation8 + $0x144] sm:$0xf0] }
  0x26   :  { %v1061_v4 = vld [vmem:[#allocation8 + $0xb0] sm:$0xf]  ;;  %v1322_v5 = vld [vmem:[#allocation8 + $0xb4] sm:$0xf0]  ;;  %v1206_v7 = vor.u32 %v1358_v3, %v1205_v2  ;;  %v1197_v11 = vld [vmem:[#allocation8 + $0x1c0] sm:$0xf]  ;;  %v1134_v18 = vor.u32 %v1340_v10, %v1133_v8 }
  0x27   :  { %620 = vmatpush.bf16.msra.mxu0 %v1014_v44  ;;  %v1356_v12 = vld [vmem:[#allocation8 + $0x1c4] sm:$0xf0]  ;;  %v1062_v13 = vor.u32 %v1322_v5, %v1061_v4  ;;  %v989_v14 = vld [vmem:[#allocation8 + $0x20] sm:$0xf]  ;;  %v1125_v20 = vld [vmem:[#allocation8 + $0x130] sm:$0xf] }
  0x28   :  { %633 = vmatpush.bf16.msra.mxu1 %v1078_v49  ;;  %v1304_v15 = vld [vmem:[#allocation8 + $0x24] sm:$0xf0]  ;;  %v1053_v16 = vld [vmem:[#allocation8 + $0xa0] sm:$0xf]  ;;  %v1198_v19 = vor.u32 %v1356_v12, %v1197_v11  ;;  %v1338_v22 = vld [vmem:[#allocation8 + $0x134] sm:$0xf0] }
  0x29   :  { %644 = vmatpush.bf16.msra.mxu2 %v1158_v46  ;;  %657 = vmatpush.bf16.msra.mxu3 %v1222_v53  ;;  %v1320_v17 = vld [vmem:[#allocation8 + $0xa4] sm:$0xf0]  ;;  %v990_v21 = vor.u32 %v1304_v15, %v989_v14  ;;  %v1189_v23 = vld [vmem:[#allocation8 + $0x1b0] sm:$0xf]  ;;  %v1354_v25 = vld [vmem:[#allocation8 + $0x1b4] sm:$0xf0]  ;;  %v1126_v31 = vor.u32 %v1338_v22, %v1125_v20 }
  0x2a   :  { %v1054_v26 = vor.u32 %v1320_v17, %v1053_v16  ;;  %v981_v27 = vld [vmem:[#allocation8 + $0x10] sm:$0xf]  ;;  %v1302_v28 = vld [vmem:[#allocation8 + $0x14] sm:$0xf0]  ;;  %v1190_v32 = vor.u32 %v1354_v25, %v1189_v23  ;;  %v973_v35 = vld [vmem:[#allocation8] sm:$0xf] }
  0x2b   :  { %621 = vmatpush.bf16.msra.mxu0 %v1006_v59  ;;  %v1045_v29 = vld [vmem:[#allocation8 + $0x90] sm:$0xf]  ;;  %v1318_v30 = vld [vmem:[#allocation8 + $0x94] sm:$0xf0]  ;;  %v982_v33 = vor.u32 %v1302_v28, %v981_v27  ;;  %v1300_v36 = vld [vmem:[#allocation8 + $0x4] sm:$0xf0] }
  0x2c   :  { %634 = vmatpush.bf16.msra.mxu1 %v1070_v0  ;;  %v1046_v34 = vor.u32 %v1318_v30, %v1045_v29  ;;  %v1037_v37 = vld [vmem:[#allocation8 + $0x80] sm:$0xf]  ;;  %v1316_v38 = vld [vmem:[#allocation8 + $0x84] sm:$0xf0]  ;;  %v1313_v39 = vld [vmem:[#allocation8 + $0x74] sm:$0xf] }
  0x2d   :  { %645 = vmatpush.bf16.msra.mxu2 %v1150_v57  ;;  %658 = vmatpush.bf16.msra.mxu3 %v1214_v62  ;;  %v1031_v40 = vld [vmem:[#allocation8 + $0x78] sm:$0xf0]  ;;  %v1329_v41 = vld [vmem:[#allocation8 + $0xf4] sm:$0xf]  ;;  %v1038_v43 = vor.u32 %v1316_v38, %v1037_v37  ;;  %v1311_v46 = vld [vmem:[#allocation8 + $0x64] sm:$0xf] }
  0x2e   :  { %v1095_v42 = vld [vmem:[#allocation8 + $0xf8] sm:$0xf0]  ;;  %v1034_v44 = vor.u32 %v1313_v39, %v1031_v40  ;;  %v1023_v47 = vld [vmem:[#allocation8 + $0x68] sm:$0xf0]  ;;  %v1327_v48 = vld [vmem:[#allocation8 + $0xe4] sm:$0xf] }
  0x2f   :  { %622 = vmatpush.bf16.msra.mxu0 %v998_v9  ;;  %v1098_v45 = vor.u32 %v1329_v41, %v1095_v42  ;;  %v1087_v49 = vld [vmem:[#allocation8 + $0xe8] sm:$0xf0]  ;;  %v1026_v50 = vor.u32 %v1311_v46, %v1023_v47  ;;  %v1117_v52 = vld [vmem:[#allocation8 + $0x120] sm:$0xf]  ;;  %v1336_v53 = vld [vmem:[#allocation8 + $0x124] sm:$0xf0] }
  0x30   :  { %970 = vmatmul.msk.bf16.vlgmr.msrb.gmra.mxu3 %vm156_vm0, %v1595_v24  ;;  %635 = vmatpush.bf16.msra.mxu1 %v1062_v13  ;;  %v1090_v51 = vor.u32 %v1327_v48, %v1087_v49  ;;  %v1181_v54 = vld [vmem:[#allocation8 + $0x1a0] sm:$0xf]  ;;  %v1118_v55 = vor.u32 %v1336_v53, %v1117_v52  ;;  %v1352_v56 = vld [vmem:[#allocation8 + $0x1a4] sm:$0xf0]  ;;  %v1309_v57 = vld [vmem:[#allocation8 + $0x54] sm:$0xf] }
  0x31   :  { %646 = vmatpush.bf16.msra.mxu2 %v1142_v6  ;;  %659 = vmatpush.bf16.msra.mxu3 %v1206_v7  ;;  %v1015_v58 = vld [vmem:[#allocation8 + $0x58] sm:$0xf0]  ;;  %v1182_v59 = vor.u32 %v1352_v56, %v1181_v54  ;;  %v1325_v61 = vld [vmem:[#allocation8 + $0xd4] sm:$0xf]  ;;  %v1109_v0 = vld [vmem:[#allocation8 + $0x110] sm:$0xf] }
  0x32   :  { %969 = vmatmul.msk.bf16.vlgmr.msrb.gmra.mxu2 %vm156_vm0, %v1595_v24  ;;  %v974_v24 = vor.u32 %v1300_v36, %v973_v35  ;;  %v1018_v60 = vor.u32 %v1309_v57, %v1015_v58  ;;  %v1079_v62 = vld [vmem:[#allocation8 + $0xd8] sm:$0xf0]  ;;  %v1334_v1 = vld [vmem:[#allocation8 + $0x114] sm:$0xf0]  ;;  %v1173_v2 = vld [vmem:[#allocation8 + $0x190] sm:$0xf] }
  0x33   :  { %623 = vmatpush.bf16.msra.mxu0 %v990_v21  ;;  %v1082_v63 = vor.u32 %v1325_v61, %v1079_v62  ;;  %v1110_v3 = vor.u32 %v1334_v1, %v1109_v0  ;;  %v1350_v4 = vld [vmem:[#allocation8 + $0x194] sm:$0xf0]  ;;  %v1307_v5 = vld [vmem:[#allocation8 + $0x44] sm:$0xf]  ;;  %v1007_v6 = vld [vmem:[#allocation8 + $0x48] sm:$0xf0] }
  0x34   :  { %636 = vmatpush.bf16.msra.mxu1 %v1054_v26  ;;  %v1174_v7 = vor.u32 %v1350_v4, %v1173_v2  ;;  %v1010_v8 = vor.u32 %v1307_v5, %v1007_v6  ;;  %v1323_v9 = vld [vmem:[#allocation8 + $0xc4] sm:$0xf]  ;;  %v1071_v10 = vld [vmem:[#allocation8 + $0xc8] sm:$0xf0]  ;;  %v1101_v12 = vld [vmem:[#allocation8 + $0x100] sm:$0xf] }
  0x35   :  { %647 = vmatpush.bf16.msra.mxu2 %v1134_v18  ;;  %660 = vmatpush.bf16.msra.mxu3 %v1198_v19  ;;  %v1074_v11 = vor.u32 %v1323_v9, %v1071_v10  ;;  %v1332_v13 = vld [vmem:[#allocation8 + $0x104] sm:$0xf0]  ;;  %v1165_v14 = vld [vmem:[#allocation8 + $0x180] sm:$0xf]  ;;  %v1305_v17 = vld [vmem:[#allocation8 + $0x34] sm:$0xf] }
  0x36   :  { %v1102_v15 = vor.u32 %v1332_v13, %v1101_v12  ;;  %v1348_v16 = vld [vmem:[#allocation8 + $0x184] sm:$0xf0]  ;;  %v999_v18 = vld [vmem:[#allocation8 + $0x38] sm:$0xf0]  ;;  %v1321_v21 = vld [vmem:[#allocation8 + $0xb4] sm:$0xf] }
  0x37   :  { %624 = vmatpush.bf16.msra.mxu0 %v982_v33  ;;  %v1166_v19 = vor.u32 %v1348_v16, %v1165_v14  ;;  %v1002_v20 = vor.u32 %v1305_v17, %v999_v18  ;;  %v1063_v22 = vld [vmem:[#allocation8 + $0xb8] sm:$0xf0]  ;;  %v1345_v23 = vld [vmem:[#allocation8 + $0x174] sm:$0xf]  ;;  %v1319_v33 = vld [vmem:[#allocation8 + $0xa4] sm:$0xf] }
  0x38   :  { %637 = vmatpush.bf16.msra.mxu1 %v1046_v34  ;;  %v1066_v25 = vor.u32 %v1321_v21, %v1063_v22  ;;  %v1159_v26 = vld [vmem:[#allocation8 + $0x178] sm:$0xf0]  ;;  %v1361_v27 = vld [vmem:[#allocation8 + $0x1f4] sm:$0xf]  ;;  %v1055_v35 = vld [vmem:[#allocation8 + $0xa8] sm:$0xf0] }
  0x39   :  { %648 = vmatpush.bf16.msra.mxu2 %v1126_v31  ;;  %661 = vmatpush.bf16.msra.mxu3 %v1190_v32  ;;  %v1223_v28 = vld [vmem:[#allocation8 + $0x1f8] sm:$0xf0]  ;;  %v1162_v29 = vor.u32 %v1345_v23, %v1159_v26  ;;  %v1303_v31 = vld [vmem:[#allocation8 + $0x24] sm:$0xf]  ;;  %v991_v32 = vld [vmem:[#allocation8 + $0x28] sm:$0xf0]  ;;  %v1058_v38 = vor.u32 %v1319_v33, %v1055_v35 }
  0x3a   :  { %v1226_v30 = vor.u32 %v1361_v27, %v1223_v28  ;;  %v994_v34 = vor.u32 %v1303_v31, %v991_v32  ;;  %v1343_v36 = vld [vmem:[#allocation8 + $0x164] sm:$0xf]  ;;  %v1151_v37 = vld [vmem:[#allocation8 + $0x168] sm:$0xf0]  ;;  %v1047_v46 = vld [vmem:[#allocation8 + $0x98] sm:$0xf0] }
  0x3b   :  { %625 = vmatpush.bf16.msra.mxu0 %v974_v24  ;;  %v1154_v39 = vor.u32 %v1343_v36, %v1151_v37  ;;  %v1359_v40 = vld [vmem:[#allocation8 + $0x1e4] sm:$0xf]  ;;  %v1215_v41 = vld [vmem:[#allocation8 + $0x1e8] sm:$0xf0]  ;;  %v1301_v24 = vld [vmem:[#allocation8 + $0x14] sm:$0xf] }
  0x3c   :  { %638 = vmatpush.bf16.msra.mxu1 %v1038_v43  ;;  %v1218_v42 = vor.u32 %v1359_v40, %v1215_v41  ;;  %v983_v43 = vld [vmem:[#allocation8 + $0x18] sm:$0xf0]  ;;  %v1341_v47 = vld [vmem:[#allocation8 + $0x154] sm:$0xf]  ;;  %v1299_v54 = vld [vmem:[#allocation8 + $0x4] sm:$0xf] }
  0x3d   :  { %649 = vmatpush.bf16.msra.mxu2 %v1118_v55  ;;  %662 = vmatpush.bf16.msra.mxu3 %v1182_v59  ;;  %v1143_v49 = vld [vmem:[#allocation8 + $0x158] sm:$0xf0]  ;;  %v975_v55 = vld [vmem:[#allocation8 + $0x8] sm:$0xf0]  ;;  %v1315_v56 = vld [vmem:[#allocation8 + $0x84] sm:$0xf] }
  0x3e   :  { %v1146_v52 = vor.u32 %v1341_v47, %v1143_v49  ;;  %v978_v57 = vor.u32 %v1299_v54, %v975_v55  ;;  %v1039_v58 = vld [vmem:[#allocation8 + $0x88] sm:$0xf0]  ;;  %v1339_v59 = vld [vmem:[#allocation8 + $0x144] sm:$0xf]  ;;  %v1337_v2 = vld [vmem:[#allocation8 + $0x134] sm:$0xf] }
  0x3f   :  { %670 = vmatpush.bf16.msrb.mxu0 %v1034_v44  ;;  %v1317_v44 = vld [vmem:[#allocation8 + $0x94] sm:$0xf]  ;;  %v1042_v61 = vor.u32 %v1315_v56, %v1039_v58  ;;  %v1199_v0 = vld [vmem:[#allocation8 + $0x1c8] sm:$0xf0]  ;;  %v106_v5 = vld [vmem:[#allocation6] sm:$0xf] }
  0x40   :  { %683 = vmatpush.bf16.msrb.mxu1 %v1098_v45  ;;  %v986_v45 = vor.u32 %v1301_v24, %v983_v43  ;;  %v1050_v48 = vor.u32 %v1317_v44, %v1047_v46  ;;  %v1353_v4 = vld [vmem:[#allocation8 + $0x1b4] sm:$0xf]  ;;  %v1335_v9 = vld [vmem:[#allocation8 + $0x124] sm:$0xf]  ;;  %v1119_v10 = vld [vmem:[#allocation8 + $0x128] sm:$0xf0] }
  0x41   :  { %650 = vmatpush.bf16.msra.mxu2 %v1110_v3  ;;  %663 = vmatpush.bf16.msra.mxu3 %v1174_v7  ;;  %v1127_v3 = vld [vmem:[#allocation8 + $0x138] sm:$0xf0]  ;;  %v1183_v12 = vld [vmem:[#allocation8 + $0x1a8] sm:$0xf0]  ;;  %v108_v13 = vperm.slane %v106_v5, 0  ;;  %v1122_v14 = vor.u32 %v1335_v9, %v1119_v10  ;;  %v110_v24 = vperm.slane %v106_v5, 2 }
  0x42   :  { %v1130_v6 = vor.u32 %v1337_v2, %v1127_v3  ;;  %v1191_v7 = vld [vmem:[#allocation8 + $0x1b8] sm:$0xf0]  ;;  %v1333_v16 = vld [vmem:[#allocation8 + $0x114] sm:$0xf]  ;;  %v1331_v27 = vld [vmem:[#allocation8 + $0x104] sm:$0xf] }
  0x43   :  { %671 = vmatpush.bf16.msrb.mxu0 %v1026_v50  ;;  %v1357_v50 = vld [vmem:[#allocation8 + $0x1d4] sm:$0xf]  ;;  %v1111_v17 = vld [vmem:[#allocation8 + $0x118] sm:$0xf0]  ;;  %v1103_v28 = vld [vmem:[#allocation8 + $0x108] sm:$0xf0] }
  0x44   :  { %684 = vmatpush.bf16.msrb.mxu1 %v1090_v51  ;;  %v1207_v51 = vld [vmem:[#allocation8 + $0x1d8] sm:$0xf0]  ;;  %v1349_v18 = vld [vmem:[#allocation8 + $0x194] sm:$0xf]  ;;  %v1114_v22 = vor.u32 %v1333_v16, %v1111_v17  ;;  %v1167_v31 = vld [vmem:[#allocation8 + $0x188] sm:$0xf0] }
  0x45   :  { %651 = vmatpush.bf16.msra.mxu2 %v1102_v15  ;;  %664 = vmatpush.bf16.msra.mxu3 %v1166_v19  ;;  %v1210_v53 = vor.u32 %v1357_v50, %v1207_v51  ;;  %v1175_v19 = vld [vmem:[#allocation8 + $0x198] sm:$0xf0]  ;;  %v1369_v56 = vld [vmem:[#allocation9 + $0x30] sm:$0xff]  ;;  %v1367_v58 = vld [vmem:[#allocation9 + $0x20] sm:$0xff]  ;;  %s921_s19 = sshll.u32 %s1529_s18, 4  ;;  %s923_s21 = sshll.u32 %s1629_s9, 4  ;;  %s922_s19 = int_to_ptr.vmem [resolvable:$true] %s921_s19  ;;  %s924_s21 = int_to_ptr.hbm [resolvable:$true] %s923_s21 }
  0x46   :  { %v1178_v23 = vor.u32 %v1349_v18, %v1175_v19  ;;  %v1370_v55 = vld [vmem:[#allocation9 + $0x38] sm:$0xff]  ;;  %v1375_v2 = vld [vmem:[#allocation9 + $0x60] sm:$0xff]  ;;  %vm914_vm8 = vcmask 8192  }
  0x47   :  { %672 = vmatpush.bf16.msrb.mxu0 %v1018_v60  ;;  %v1135_v60 = vld [vmem:[#allocation8 + $0x148] sm:$0xf0]  ;;  %v292_v10 = vld [vmem:[%s1624_s4] sm:$0x3] }
  0x48   :  { %685 = vmatpush.bf16.msrb.mxu1 %v1082_v63  ;;  %v1138_v62 = vor.u32 %v1339_v59, %v1135_v60  ;;  %v1355_v63 = vld [vmem:[#allocation8 + $0x1c4] sm:$0xf]  ;;  %v1366_v59 = vld [vmem:[#allocation9 + $0x18] sm:$0xff] }
  0x49   :  { %696 = vmatpush.bf16.msrb.mxu2 %v1162_v29  ;;  %709 = vmatpush.bf16.msrb.mxu3 %v1226_v30  ;;  %v1202_v1 = vor.u32 %v1355_v63, %v1199_v0  ;;  %v1347_v30 = vld [vmem:[#allocation8 + $0x184] sm:$0xf]  ;;  %v1378_v60 = vld [vmem:[#allocation9 + $0x78] sm:$0xff]  ;;  %v1364_v63 = vld [vmem:[#allocation9 + $0x8] sm:$0xff] }
  0x4a   :  { %v1170_v36 = vor.u32 %v1347_v30, %v1167_v31  ;;  %v1376_v0 = vld [vmem:[#allocation9 + $0x68] sm:$0xff] }
  0x4b   :  { %673 = vmatpush.bf16.msrb.mxu0 %v1010_v8  ;;  %v1194_v8 = vor.u32 %v1353_v4, %v1191_v7  ;;  %v1374_v4 = vld [vmem:[#allocation9 + $0x58] sm:$0xff] }
  0x4c   :  { %686 = vmatpush.bf16.msrb.mxu1 %v1074_v11  ;;  %v1351_v11 = vld [vmem:[#allocation8 + $0x1a4] sm:$0xf] }
  0x4d   :  { %697 = vmatpush.bf16.msrb.mxu2 %v1154_v39  ;;  %710 = vmatpush.bf16.msrb.mxu3 %v1218_v42  ;;  %v1186_v15 = vor.u32 %v1351_v11, %v1183_v12  ;;  %v111_v42 = vperm.slane %v106_v5, 3  ;;  %v1371_v11 = vld [vmem:[#allocation9 + $0x40] sm:$0xff]  ;;  %v294_v12 = vperm.slane %v292_v10, 0 }
  0x4f   :  { %674 = vmatpush.bf16.msrb.mxu0 %v1002_v20  ;;  %v109_v20 = vperm.slane %v106_v5, 1 }
  0x50   :  { %687 = vmatpush.bf16.msrb.mxu1 %v1066_v25 }
  0x51   :  { %698 = vmatpush.bf16.msrb.mxu2 %v1146_v52  ;;  %711 = vmatpush.bf16.msrb.mxu3 %v1210_v53 }
  0x53   :  { %675 = vmatpush.bf16.msrb.mxu0 %v994_v34  ;;  %v1106_v34 = vor.u32 %v1331_v27, %v1103_v28 }
  0x54   :  { %688 = vmatpush.bf16.msrb.mxu1 %v1058_v38 }
  0x55   :  { %699 = vmatpush.bf16.msrb.mxu2 %v1138_v62  ;;  %712 = vmatpush.bf16.msrb.mxu3 %v1202_v1  ;;  %v1377_v62 = vld [vmem:[#allocation9 + $0x70] sm:$0xff]  ;;  %v1363_v1 = vld [vmem:[#allocation9] sm:$0xff] }
  0x57   :  { %676 = vmatpush.bf16.msrb.mxu0 %v986_v45 }
  0x58   :  { %689 = vmatpush.bf16.msrb.mxu1 %v1050_v48 }
  0x59   :  { %700 = vmatpush.bf16.msrb.mxu2 %v1130_v6  ;;  %713 = vmatpush.bf16.msrb.mxu3 %v1194_v8  ;;  %v1373_v6 = vld [vmem:[#allocation9 + $0x50] sm:$0xff]  ;;  %v1372_v8 = vld [vmem:[#allocation9 + $0x48] sm:$0xff] }
  0x5b   :  { %677 = vmatpush.bf16.msrb.mxu0 %v978_v57  ;;  %v1368_v57 = vld [vmem:[#allocation9 + $0x28] sm:$0xff] }
  0x5c   :  { %690 = vmatpush.bf16.msrb.mxu1 %v1042_v61  ;;  %v1365_v61 = vld [vmem:[#allocation9 + $0x10] sm:$0xff] }
  0x5d   :  { %701 = vmatpush.bf16.msrb.mxu2 %v1122_v14  ;;  %714 = vmatpush.bf16.msrb.mxu3 %v1186_v15 }
  0x61   :  { %702 = vmatpush.bf16.msrb.mxu2 %v1114_v22  ;;  %715 = vmatpush.bf16.msrb.mxu3 %v1178_v23 }
  0x65   :  { %703 = vmatpush.bf16.msrb.mxu2 %v1106_v34  ;;  %716 = vmatpush.bf16.msrb.mxu3 %v1170_v36 }
  0xa3   :  { %v169_v21 = vpop.f32.mrf.mxu3 }
  0xa4   :  { %v170_v25 = vadd.f32 %v169_v21, %v108_v13 }
  0xa5   :  { %v182_v26 = vpop.f32.mrf.mxu2 }
  0xa6   :  { %v183_v29 = vadd.f32 %v182_v26, %v109_v20  ;;  %v216_v32 = vmul.f32 0.2, %v170_v25  ;;  %vm212_vm1 = vcmp.gt.f32.partialorder %v170_v25, 0.0 }
  0xa8   :  { %v217_v33 = vmul.f32 0.2, %v183_v29  ;;  %vm213_vm2 = vcmp.gt.f32.partialorder %v183_v29, 0.0  ;;  %v220_v35 = vsel %vm212_vm1, %v170_v25, %v216_v32  ;;  %v295_v25 = vperm.slane %v292_v10, 1 }
  0xa9   :  { %v224_v37 = vpack.c.bf16 %v220_v35, %v220_v35 }
  0xaa   :  { %v221_v38 = vsel %vm213_vm2, %v183_v29, %v217_v33 }
  0xab   :  { %v225_v39 = vpack.c.bf16 %v221_v38, %v221_v38  ;;  %v171_v40 = vpop.f32.mrf.mxu3  ;;  %626 = vmatmul.bf16.vlgmr.msra.gmra.mxu0 %v224_v37 }
  0xac   :  { %862 = vmatpush.bf16.msra.mxu0 %v1370_v55 }
  0xad   :  { %v184_v41 = vpop.f32.mrf.mxu2  ;;  %639 = vmatmul.bf16.vlgmr.msra.gmra.mxu1 %v225_v39 }
  0xae   :  { %875 = vmatpush.bf16.msra.mxu1 %v1378_v60 }
  0xb0   :  { %863 = vmatpush.bf16.msra.mxu0 %v1369_v56 }
  0xb2   :  { %876 = vmatpush.bf16.msra.mxu1 %v1377_v62 }
  0xb3   :  { %v208_v43 = vpop.f32.mrf.mxu3 }
  0xb4   :  { %v209_v45 = vadd.f32 %v208_v43, %v111_v42  ;;  %864 = vmatpush.bf16.msra.mxu0 %v1368_v57 }
  0xb5   :  { %v195_v44 = vpop.f32.mrf.mxu2 }
  0xb6   :  { %v196_v46 = vadd.f32 %v195_v44, %v110_v24  ;;  %vm215_vm3 = vcmp.gt.f32.partialorder %v209_v45, 0.0  ;;  %v219_v47 = vmul.f32 0.2, %v209_v45  ;;  %877 = vmatpush.bf16.msra.mxu1 %v1376_v0  ;;  %v1390_v24 = vld [vmem:[%s1626_s6] ss:$0 sm:$0xff] }
  0xb8   :  { %vm214_vm4 = vcmp.gt.f32.partialorder %v196_v46, 0.0  ;;  %v218_v48 = vmul.f32 0.2, %v196_v46  ;;  %v223_v49 = vsel %vm215_vm3, %v209_v45, %v219_v47  ;;  %865 = vmatpush.bf16.msra.mxu0 %v1367_v58 }
  0xb9   :  { %v227_v51 = vpack.c.bf16 %v223_v49, %v223_v49 }
  0xba   :  { %v222_v50 = vsel %vm214_vm4, %v196_v46, %v218_v48  ;;  %878 = vmatpush.bf16.msra.mxu1 %v1375_v2  ;;  %v891_v48 = vld [vmem:[%s1627_s7] sm:$0x1] }
  0xbb   :  { %v226_v52 = vpack.c.bf16 %v222_v50, %v222_v50  ;;  %v210_v53 = vpop.f32.mrf.mxu3  ;;  %665 = vmatmul.bf16.vlgmr.msra.gmra.mxu3 %v227_v51  ;;  %678 = vmatmul.bf16.vlgmr.msrb.gmra.mxu0 %v224_v37  ;;  %v893_v50 = vstv %s1628_s8 }
  0xbc   :  { %866 = vmatpush.bf16.msra.mxu0 %v1366_v59 }
  0xbd   :  { %v197_v54 = vpop.f32.mrf.mxu2  ;;  %652 = vmatmul.bf16.vlgmr.msra.gmra.mxu2 %v226_v52  ;;  %691 = vmatmul.bf16.vlgmr.msrb.gmra.mxu1 %v225_v39 }
  0xbe   :  { %879 = vmatpush.bf16.msra.mxu1 %v1374_v4 }
  0xc0   :  { %867 = vmatpush.bf16.msra.mxu0 %v1365_v61 }
  0xc2   :  { %880 = vmatpush.bf16.msra.mxu1 %v1373_v6 }
  0xc4   :  { %868 = vmatpush.bf16.msra.mxu0 %v1364_v63 }
  0xc6   :  { %881 = vmatpush.bf16.msra.mxu1 %v1372_v8 }
  0xc8   :  { %869 = vmatpush.bf16.msra.mxu0 %v1363_v1 }
  0xca   :  { %882 = vmatpush.bf16.msra.mxu1 %v1371_v11 }
  0xcb   :  { %717 = vmatmul.bf16.vlgmr.msrb.gmra.mxu3 %v227_v51 }
  0xcd   :  { %704 = vmatmul.bf16.vlgmr.msrb.gmra.mxu2 %v226_v52 }
 0x128   :  { %v627_v3 = vpop.f32.mrf.mxu0 }
 0x129   :  { %v628_v15 = vadd.f32 %v627_v3, %v294_v12 }
 0x12a   :  { %v640_v5 = vpop.f32.mrf.mxu1 }
 0x12b   :  { %v641_v16 = vadd.f32 %v640_v5, %v628_v15 }
 0x130   :  { %v629_v7 = vpop.f32.mrf.mxu0 }
 0x132   :  { %v642_v9 = vpop.f32.mrf.mxu1 }
 0x138   :  { %v679_v13 = vpop.f32.mrf.mxu0 }
 0x139   :  { %v680_v30 = vadd.f32 %v679_v13, %v295_v25 }
 0x13a   :  { %v692_v14 = vpop.f32.mrf.mxu1 }
 0x13b   :  { %v693_v31 = vadd.f32 %v692_v14, %v680_v30 }
 0x13e   :  { %v666_v17 = vpop.f32.mrf.mxu3 }
 0x140   :  { %v653_v18 = vpop.f32.mrf.mxu2  ;;  %v681_v20 = vpop.f32.mrf.mxu0 }
 0x141   :  { %v654_v19 = vadd.f32 %v653_v18, %v641_v16 }
 0x142   :  { %v694_v21 = vpop.f32.mrf.mxu1 }
 0x143   :  { %v667_v22 = vadd.f32 %v666_v17, %v654_v19 }
 0x145   :  { %vm722_vm5 = vcmp.gt.f32.partialorder %v667_v22, 0.0  ;;  %v724_v23 = vmul.f32 0.2, %v667_v22 }
 0x146   :  { %v668_v27 = vpop.f32.mrf.mxu3 }
 0x147   :  { %v726_v26 = vsel %vm722_vm5, %v667_v22, %v724_v23 }
 0x148   :  { %v728_v28 = vpack.c.bf16 %v726_v26, %v726_v26  ;;  %v655_v29 = vpop.f32.mrf.mxu2 }
 0x14a   :  { %870 = vmatmul.bf16.vlgmr.msra.gmra.mxu0 %v728_v28 }
 0x14e   :  { %v718_v32 = vpop.f32.mrf.mxu3 }
 0x150   :  { %v705_v33 = vpop.f32.mrf.mxu2 }
 0x151   :  { %v706_v34 = vadd.f32 %v705_v33, %v693_v31 }
 0x153   :  { %v719_v35 = vadd.f32 %v718_v32, %v706_v34 }
 0x155   :  { %vm723_vm6 = vcmp.gt.f32.partialorder %v719_v35, 0.0  ;;  %v725_v36 = vmul.f32 0.2, %v719_v35 }
 0x156   :  { %v720_v38 = vpop.f32.mrf.mxu3 }
 0x157   :  { %v727_v37 = vsel %vm723_vm6, %v719_v35, %v725_v36 }
 0x158   :  { %v729_v39 = vpack.c.bf16 %v727_v37, %v727_v37  ;;  %v707_v40 = vpop.f32.mrf.mxu2 }
 0x15a   :  { %883 = vmatmul.bf16.vlgmr.msra.gmra.mxu1 %v729_v39 }
 0x1c7   :  { %v871_v41 = vpop.f32.mrf.mxu0 }
 0x1c8   :  { %v872_v43 = vadd.f32 %v1390_v24, %v871_v41 }
 0x1cf   :  { %v873_v42 = vpop.f32.mrf.mxu0 }
 0x1d7   :  { %v884_v44 = vpop.f32.mrf.mxu1 }
 0x1d8   :  { %v885_v45 = vadd.f32 %v884_v44, %v872_v43 }
 0x1da   :  { %vm888_vm7 = vcmp.gt.f32.partialorder %v885_v45, 0.0  ;;  %v889_v46 = vmul.f32 0.2, %v885_v45 }
 0x1dc   :  { %v890_v47 = vsel %vm888_vm7, %v885_v45, %v889_v46 }
 0x1dd   :  { %909 = vmatpush.xpose.msra.mxu2 %v890_v47 }
 0x1df   :  { %v886_v49 = vpop.f32.mrf.mxu1 }
 0x1e0   :  { %910 = vmatmul.f32.vlgmr.msra.gmra.mxu2 %v891_v48 }
 0x263   :  { %v911_v51 = vpop.f32.mrf.mxu2 }
 0x264   :  { %v912_v52 = vadd.f32 %v911_v51, %v893_v50 }
 0x266   :  { %915 = vst.msk [vmem:[#allocation11] sm:$0x1] %vm914_vm8, %v912_v52 }
 0x267   :  { %926 = dma.vmem_to_hbm [thread:$0]  %s922_s19, 16, %s924_s21, [#allocation5]  }
 0x268   :  { %1517 = dma.done.wait [#allocation5], 16  }
 0x269   :  { %1518 = vsyncadd [#allocation5], 4294967280 }
 0x26a   :  { %931 = vsyncpa [#allocation4], 1 }
 0x26b   :  { %932 = vsyncpa [#allocation7], 1 }
 0x26c   :  { %933 = vsyncpa [#allocation10], 1 }
 0x26d   :  { %934 = vsyncpa [#allocation5], 1 }

</bundles_post_ra>
